<compile_context>
chip_gen: v6e
topology: v6e:2x2x1
jax: 0.10.0
libtpu: 0.0.40
codegen_flags: <defaults>
</compile_context>

<pallas_src>
import functools

import jax
import jax.numpy as jnp
from jax.experimental import pallas as pl
from jax.experimental.pallas import tpu as pltpu

EPS = 1e-5  # nn.BatchNorm2d default


def _fused_block_kernel(x_ref, w1_ref, w2_ref, p_ref, mask_ref, o_ref, pat_ref,
                        *, n_valid, w_pad, pp, ci, co):
    """Two fused conv3x3 + BN(train) + ReLU stages, channel-first flat layout.

    x_ref    : (CI, PP)    zero-padded input, flattened (n, row, col) on lanes
    w1_ref   : (CO, 9*CI)  stage-1 weights, tap-major / in-channel-minor packing
    w2_ref   : (CO, 9*CO)  stage-2 weights
    p_ref    : (CO, 4)     columns = [gamma1, beta1, gamma2, beta2]
    mask_ref : (1, PP)     1.0 on interior (valid output) lanes, else 0.0
    o_ref    : (CO, PP)    output (interior lanes valid)
    pat_ref  : (9*max(CI,CO), PP) VMEM im2col scratch (shared by both stages)
    """
    mask = mask_ref[...]
    p = p_ref[...]
    inv_n = 1.0 / float(n_valid)

    def conv3x3(x_flat, w_ref, cin):
        # Build the im2col matrix with 9 lane-rolls of the padded activation.
        # For every interior output lane q, roll(x, -off)[q] == x[q + off]
        # exactly (no wraparound); wrapped values only hit masked lanes.
        for t in range(9):
            dy, dx = t // 3, t % 3
            off = (dy - 1) * w_pad + (dx - 1)
            tap = x_flat if off == 0 else pltpu.roll(x_flat, (-off) % pp, axis=1)
            pat_ref[t * cin:(t + 1) * cin, :] = tap          # sublane-aligned
        return jnp.dot(w_ref[...], pat_ref[0:9 * cin, :],
                       preferred_element_type=jnp.float32)    # (CO, PP)

    def bn_relu(acc, gamma, beta):
        # Training-mode BatchNorm2d over the n_valid interior positions,
        # one-pass stats, gamma folded into the normalization scale.
        am = acc * mask
        mean = jnp.sum(am, axis=1, keepdims=True) * inv_n
        var = jnp.sum(am * am, axis=1, keepdims=True) * inv_n - mean * mean
        scale = gamma * jax.lax.rsqrt(var + EPS)
        shift = beta - mean * scale
        return jnp.maximum(acc * scale + shift, 0.0)

    # Stage 1. (Conv bias omitted: exactly cancelled by BN mean subtraction.)
    y1 = bn_relu(conv3x3(x_ref[...], w1_ref, ci), p[:, 0:1], p[:, 1:2])
    # Masking re-zeroes halo / tail lanes == zero padding of the stage-2 input.
    y1 = y1 * mask
    # Stage 2: intermediate never leaves VMEM.
    y2 = bn_relu(conv3x3(y1, w2_ref, co), p[:, 2:3], p[:, 3:4])
    o_ref[...] = y2 * mask


def _round_up(v, m):
    return (v + m - 1) // m * m


@jax.jit
def contracting_block_forward(x_nchw, params):
    """Full contractingblock forward. Input/output in PyTorch NCHW layout."""
    N, Ci, H, W = x_nchw.shape
    Co = params["w1"].shape[0]
    CI = _round_up(Ci, 8)                    # sublane-aligned input channels
    CO = _round_up(Co, 8)                    # sublane-aligned output channels
    Hp, Wp = H + 2, W + 2
    P = N * Hp * Wp                          # padded-flat spatial size
    PP = _round_up(P, 128)                   # lane-aligned
    NHW = N * H * W
    f32 = jnp.float32

    # Input: NCHW -> channel-first, spatially zero-padded, flattened, lane-padded.
    xp = jnp.pad(x_nchw.astype(f32), ((0, 0), (0, 0), (1, 1), (1, 1)))
    xp = jnp.transpose(xp, (1, 0, 2, 3)).reshape(Ci, P)
    x_flat = jnp.zeros((CI, PP), f32).at[:Ci, :P].set(xp)

    # Interior mask: 1.0 where a real (non-halo, non-tail) output position lives.
    m = jnp.zeros((N, Hp, Wp), f32).at[:, 1:H + 1, 1:W + 1].set(1.0)
    mask = jnp.zeros((1, PP), f32).at[:, :P].set(m.reshape(1, P))

    def pack_w(w, cin_pad):  # PyTorch OIHW -> (CO, 9*cin_pad), tap-major packing
        co_, ci_ = w.shape[0], w.shape[1]
        wt = jnp.transpose(w.astype(f32), (0, 2, 3, 1))          # (Co, 3, 3, Ci)
        wp = jnp.zeros((CO, 3, 3, cin_pad), f32).at[:co_, :, :, :ci_].set(wt)
        return wp.reshape(CO, 9 * cin_pad)

    w1p = pack_w(params["w1"], CI)
    w2p = pack_w(params["w2"], CO)

    # BN affine params for both stages in one small operand (conv biases b1/b2
    # are NOT passed: training-mode BN cancels them exactly).
    ones, zeros = jnp.ones((CO,), f32), jnp.zeros((CO,), f32)
    pparams = jnp.stack(
        [ones.at[:Co].set(params["g1"].astype(f32)),
         zeros.at[:Co].set(params["be1"].astype(f32)),
         ones.at[:Co].set(params["g2"].astype(f32)),
         zeros.at[:Co].set(params["be2"].astype(f32))], axis=1)   # (CO, 4)

    CS = max(CI, CO)
    kernel = functools.partial(_fused_block_kernel,
                               n_valid=NHW, w_pad=Wp, pp=PP, ci=CI, co=CO)

    out_flat = pl.pallas_call(
        kernel,
        out_shape=jax.ShapeDtypeStruct((CO, PP), f32),
        grid=(1,),   # whole (tiny) problem in one VMEM-resident step
        in_specs=[
            pl.BlockSpec((CI, PP), lambda i: (0, 0)),
            pl.BlockSpec((CO, 9 * CI), lambda i: (0, 0)),
            pl.BlockSpec((CO, 9 * CO), lambda i: (0, 0)),
            pl.BlockSpec((CO, 4), lambda i: (0, 0)),
            pl.BlockSpec((1, PP), lambda i: (0, 0)),
        ],
        out_specs=pl.BlockSpec((CO, PP), lambda i: (0, 0)),
        scratch_shapes=[pltpu.VMEM((9 * CS, PP), f32)],
        compiler_params=pltpu.CompilerParams(
            dimension_semantics=("arbitrary",)),
    )(x_flat, w1p, w2p, pparams, mask)

    # (CO, PP) -> interior positions -> NCHW
    out = out_flat[:Co, :P].reshape(Co, N, Hp, Wp)[:, :, 1:H + 1, 1:W + 1]
    return jnp.transpose(out, (1, 0, 2, 3))


# ---------------------- pure-JAX reference (for validation) ----------------
def _ref_stage(x, w, b, g, be):
    y = jax.lax.conv_general_dilated(
        x, w, window_strides=(1, 1), padding="SAME",
        dimension_numbers=("NCHW", "OIHW", "NCHW"))
    y = y + b.reshape(1, -1, 1, 1)
    mean = jnp.mean(y, axis=(0, 2, 3), keepdims=True)
    var = jnp.mean((y - mean) ** 2, axis=(0, 2, 3), keepdims=True)   # biased
    y = (y - mean) * jax.lax.rsqrt(var + EPS) * g.reshape(1, -1, 1, 1) \
        + be.reshape(1, -1, 1, 1)
    return jnp.maximum(y, 0.0)


def _ref_forward(x, p):
    x = _ref_stage(x, p["w1"], p["b1"], p["g1"], p["be1"])
    return _ref_stage(x, p["w2"], p["b2"], p["g2"], p["be2"])


# ---------------------------------- main ------------------------------------
if __name__ == "__main__":
    key = jax.random.PRNGKey(0)
    N, Cin, Cout, H, W = 2, 4, 8, 16, 16
    k1, k2, k3, k4, kx = jax.random.split(key, 5)

    # PyTorch-style (kaiming-uniform-ish) init, OIHW layout like nn.Conv2d.
    bound1 = 1.0 / (Cin * 9) ** 0.5
    w1 = jax.random.uniform(k1, (Cout, Cin, 3, 3), jnp.float32, -bound1, bound1)
    b1 = jax.random.uniform(k2, (Cout,), jnp.float32, -bound1, bound1)
    bound2 = 1.0 / (Cout * 9) ** 0.5
    w2 = jax.random.uniform(k3, (Cout, Cout, 3, 3), jnp.float32, -bound2, bound2)
    b2 = jax.random.uniform(k4, (Cout,), jnp.float32, -bound2, bound2)

    params = {
        "w1": w1, "b1": b1,
        "g1": jnp.ones((Cout,), jnp.float32), "be1": jnp.zeros((Cout,), jnp.float32),
        "w2": w2, "b2": b2,
        "g2": jnp.ones((Cout,), jnp.float32), "be2": jnp.zeros((Cout,), jnp.float32),
    }
    x = jax.random.normal(kx, (N, Cin, H, W), jnp.float32)   # NCHW like PyTorch

    out = jax.block_until_ready(contracting_block_forward(x, params))
    ref = jax.block_until_ready(_ref_forward(x, params))

    assert out.shape == (N, Cout, H, W)
    err = float(jnp.max(jnp.abs(out - ref)))
    assert jnp.allclose(out, ref, atol=1e-3, rtol=1e-3), f"mismatch vs ref: {err}"
    print("KERNEL_OK")
</pallas_src>

<mosaic_0001>
module attributes {stable_mosaic.version = 11 : i64} {
  func.func @_fused_block_kernel(%arg0: i32, %arg1: memref<8x768xf32, #tpu.memory_space<vmem>>, %arg2: memref<8x72xf32, #tpu.memory_space<vmem>>, %arg3: memref<8x72xf32, #tpu.memory_space<vmem>>, %arg4: memref<8x4xf32, #tpu.memory_space<vmem>>, %arg5: memref<1x768xf32, #tpu.memory_space<vmem>>, %arg6: memref<8x768xf32, #tpu.memory_space<vmem>>, %arg7: memref<72x768xf32, #tpu.memory_space<vmem>>) attributes {dimension_semantics = [#tpu.dimension_semantics<arbitrary>], iteration_bounds = array<i64: 1>, scalar_prefetch = 0 : i64, scratch_operands = 1 : i64, tpu.core_type = #tpu.core_type<tc>, window_params = [{pipeline_mode = #tpu.pipeline_mode<synchronous>, transform_indices = @transform_0, window_bounds = array<i64: 8, 768>}, {pipeline_mode = #tpu.pipeline_mode<synchronous>, transform_indices = @transform_1, window_bounds = array<i64: 8, 72>}, {pipeline_mode = #tpu.pipeline_mode<synchronous>, transform_indices = @transform_2, window_bounds = array<i64: 8, 72>}, {pipeline_mode = #tpu.pipeline_mode<synchronous>, transform_indices = @transform_3, window_bounds = array<i64: 8, 4>}, {pipeline_mode = #tpu.pipeline_mode<synchronous>, transform_indices = @transform_4, window_bounds = array<i64: 1, 768>}, {pipeline_mode = #tpu.pipeline_mode<synchronous>, transform_indices = @transform_5, window_bounds = array<i64: 8, 768>}]} {
    %c0 = arith.constant 0 : index
    %c0_0 = arith.constant 0 : index
    %0 = vector.load %arg5[%c0, %c0_0] : memref<1x768xf32, #tpu.memory_space<vmem>>, vector<1x768xf32>
    %c0_1 = arith.constant 0 : index
    %c0_2 = arith.constant 0 : index
    %1 = vector.load %arg4[%c0_1, %c0_2] : memref<8x4xf32, #tpu.memory_space<vmem>>, vector<8x4xf32>
    %c0_3 = arith.constant 0 : index
    %c0_4 = arith.constant 0 : index
    %2 = vector.load %arg1[%c0_3, %c0_4] : memref<8x768xf32, #tpu.memory_space<vmem>>, vector<8x768xf32>
    %c19_i32 = arith.constant 19 : i32
    %3 = tpu.dynamic_rotate %2 by %c19_i32 dim 1 : vector<8x768xf32>, i32 -> vector<8x768xf32>
    %c0_5 = arith.constant 0 : index
    %c0_6 = arith.constant 0 : index
    %4 = vector.load %arg7[%c0_5, %c0_6] : memref<72x768xf32, #tpu.memory_space<vmem>>, vector<8x768xf32>
    tpu.vector_store %arg7[%c0_5, %c0_6], %3 {strides = array<i32>} : memref<72x768xf32, #tpu.memory_space<vmem>>, vector<8x768xf32>,
    %c18_i32 = arith.constant 18 : i32
    %5 = tpu.dynamic_rotate %2 by %c18_i32 dim 1 : vector<8x768xf32>, i32 -> vector<8x768xf32>
    %c8 = arith.constant 8 : index
    %c0_7 = arith.constant 0 : index
    %6 = vector.load %arg7[%c8, %c0_7] : memref<72x768xf32, #tpu.memory_space<vmem>>, vector<8x768xf32>
    tpu.vector_store %arg7[%c8, %c0_7], %5 {strides = array<i32>} : memref<72x768xf32, #tpu.memory_space<vmem>>, vector<8x768xf32>,
    %c17_i32 = arith.constant 17 : i32
    %7 = tpu.dynamic_rotate %2 by %c17_i32 dim 1 : vector<8x768xf32>, i32 -> vector<8x768xf32>
    %c16 = arith.constant 16 : index
    %c0_8 = arith.constant 0 : index
    %8 = vector.load %arg7[%c16, %c0_8] : memref<72x768xf32, #tpu.memory_space<vmem>>, vector<8x768xf32>
    tpu.vector_store %arg7[%c16, %c0_8], %7 {strides = array<i32>} : memref<72x768xf32, #tpu.memory_space<vmem>>, vector<8x768xf32>,
    %c1_i32 = arith.constant 1 : i32
    %9 = tpu.dynamic_rotate %2 by %c1_i32 dim 1 : vector<8x768xf32>, i32 -> vector<8x768xf32>
    %c24 = arith.constant 24 : index
    %c0_9 = arith.constant 0 : index
    %10 = vector.load %arg7[%c24, %c0_9] : memref<72x768xf32, #tpu.memory_space<vmem>>, vector<8x768xf32>
    tpu.vector_store %arg7[%c24, %c0_9], %9 {strides = array<i32>} : memref<72x768xf32, #tpu.memory_space<vmem>>, vector<8x768xf32>,
    %c32 = arith.constant 32 : index
    %c0_10 = arith.constant 0 : index
    %11 = vector.load %arg7[%c32, %c0_10] : memref<72x768xf32, #tpu.memory_space<vmem>>, vector<8x768xf32>
    tpu.vector_store %arg7[%c32, %c0_10], %2 {strides = array<i32>} : memref<72x768xf32, #tpu.memory_space<vmem>>, vector<8x768xf32>,
    %c767_i32 = arith.constant 767 : i32
    %12 = tpu.dynamic_rotate %2 by %c767_i32 dim 1 : vector<8x768xf32>, i32 -> vector<8x768xf32>
    %c40 = arith.constant 40 : index
    %c0_11 = arith.constant 0 : index
    %13 = vector.load %arg7[%c40, %c0_11] : memref<72x768xf32, #tpu.memory_space<vmem>>, vector<8x768xf32>
    tpu.vector_store %arg7[%c40, %c0_11], %12 {strides = array<i32>} : memref<72x768xf32, #tpu.memory_space<vmem>>, vector<8x768xf32>,
    %c751_i32 = arith.constant 751 : i32
    %14 = tpu.dynamic_rotate %2 by %c751_i32 dim 1 : vector<8x768xf32>, i32 -> vector<8x768xf32>
    %c48 = arith.constant 48 : index
    %c0_12 = arith.constant 0 : index
    %15 = vector.load %arg7[%c48, %c0_12] : memref<72x768xf32, #tpu.memory_space<vmem>>, vector<8x768xf32>
    tpu.vector_store %arg7[%c48, %c0_12], %14 {strides = array<i32>} : memref<72x768xf32, #tpu.memory_space<vmem>>, vector<8x768xf32>,
    %c750_i32 = arith.constant 750 : i32
    %16 = tpu.dynamic_rotate %2 by %c750_i32 dim 1 : vector<8x768xf32>, i32 -> vector<8x768xf32>
    %c56 = arith.constant 56 : index
    %c0_13 = arith.constant 0 : index
    %17 = vector.load %arg7[%c56, %c0_13] : memref<72x768xf32, #tpu.memory_space<vmem>>, vector<8x768xf32>
    tpu.vector_store %arg7[%c56, %c0_13], %16 {strides = array<i32>} : memref<72x768xf32, #tpu.memory_space<vmem>>, vector<8x768xf32>,
    %c749_i32 = arith.constant 749 : i32
    %18 = tpu.dynamic_rotate %2 by %c749_i32 dim 1 : vector<8x768xf32>, i32 -> vector<8x768xf32>
    %c64 = arith.constant 64 : index
    %c0_14 = arith.constant 0 : index
    %19 = vector.load %arg7[%c64, %c0_14] : memref<72x768xf32, #tpu.memory_space<vmem>>, vector<8x768xf32>
    tpu.vector_store %arg7[%c64, %c0_14], %18 {strides = array<i32>} : memref<72x768xf32, #tpu.memory_space<vmem>>, vector<8x768xf32>,
    %c0_15 = arith.constant 0 : index
    %c0_16 = arith.constant 0 : index
    %20 = vector.load %arg2[%c0_15, %c0_16] : memref<8x72xf32, #tpu.memory_space<vmem>>, vector<8x72xf32>
    %c0_17 = arith.constant 0 : index
    %c0_18 = arith.constant 0 : index
    %21 = vector.load %arg7[%c0_17, %c0_18] : memref<72x768xf32, #tpu.memory_space<vmem>>, vector<72x768xf32>
    %cst = arith.constant dense<0.000000e+00> : vector<8x768xf32>
    %22 = tpu.matmul %20, %21, %cst {dimension_numbers = #tpu.dot_dimension_numbers<[1], [0], [0], [1], [0, 0, 1, 1], [], []>} : vector<8x72xf32>, vector<72x768xf32>, vector<8x768xf32> -> vector<8x768xf32>
    %23 = vector.extract_strided_slice %1 {offsets = [0, 0], sizes = [8, 1], strides = [1, 1]} : vector<8x4xf32> to vector<8x1xf32>
    %24 = vector.extract_strided_slice %1 {offsets = [0, 1], sizes = [8, 1], strides = [1, 1]} : vector<8x4xf32> to vector<8x1xf32>
    %25 = vector.broadcast %0 : vector<1x768xf32> to vector<8x768xf32>
    %26 = arith.mulf %22, %25 : vector<8x768xf32>
    %cst_19 = arith.constant dense<0.000000e+00> : vector<8xf32>
    %27 = vector.multi_reduction <add>, %26, %cst_19 [1] : vector<8x768xf32> to vector<8xf32>
    %28 = vector.shape_cast %27 : vector<8xf32> to vector<8x1xf32>
    %cst_20 = arith.constant 0.001953125 : f32
    %29 = vector.broadcast %cst_20 : f32 to vector<8x1xf32>
    %30 = arith.mulf %28, %29 : vector<8x1xf32>
    %31 = arith.mulf %26, %26 : vector<8x768xf32>
    %cst_21 = arith.constant dense<0.000000e+00> : vector<8xf32>
    %32 = vector.multi_reduction <add>, %31, %cst_21 [1] : vector<8x768xf32> to vector<8xf32>
    %33 = vector.shape_cast %32 : vector<8xf32> to vector<8x1xf32>
    %cst_22 = arith.constant 0.001953125 : f32
    %34 = vector.broadcast %cst_22 : f32 to vector<8x1xf32>
    %35 = arith.mulf %33, %34 : vector<8x1xf32>
    %36 = arith.mulf %30, %30 : vector<8x1xf32>
    %37 = arith.subf %35, %36 : vector<8x1xf32>
    %cst_23 = arith.constant 9.99999974E-6 : f32
    %38 = vector.broadcast %cst_23 : f32 to vector<8x1xf32>
    %39 = arith.addf %37, %38 : vector<8x1xf32>
    %40 = math.rsqrt %39 : vector<8x1xf32>
    %41 = arith.mulf %23, %40 : vector<8x1xf32>
    %42 = arith.mulf %30, %41 : vector<8x1xf32>
    %43 = arith.subf %24, %42 : vector<8x1xf32>
    %44 = vector.broadcast %41 : vector<8x1xf32> to vector<8x768xf32>
    %45 = arith.mulf %22, %44 : vector<8x768xf32>
    %46 = vector.broadcast %43 : vector<8x1xf32> to vector<8x768xf32>
    %47 = arith.addf %45, %46 : vector<8x768xf32>
    %cst_24 = arith.constant 0.000000e+00 : f32
    %48 = vector.broadcast %cst_24 : f32 to vector<8x768xf32>
    %49 = arith.maximumf %47, %48 : vector<8x768xf32>
    %50 = vector.broadcast %0 : vector<1x768xf32> to vector<8x768xf32>
    %51 = arith.mulf %49, %50 : vector<8x768xf32>
    %c19_i32_25 = arith.constant 19 : i32
    %52 = tpu.dynamic_rotate %51 by %c19_i32_25 dim 1 : vector<8x768xf32>, i32 -> vector<8x768xf32>
    %c0_26 = arith.constant 0 : index
    %c0_27 = arith.constant 0 : index
    %53 = vector.load %arg7[%c0_26, %c0_27] : memref<72x768xf32, #tpu.memory_space<vmem>>, vector<8x768xf32>
    tpu.vector_store %arg7[%c0_26, %c0_27], %52 {strides = array<i32>} : memref<72x768xf32, #tpu.memory_space<vmem>>, vector<8x768xf32>,
    %c18_i32_28 = arith.constant 18 : i32
    %54 = tpu.dynamic_rotate %51 by %c18_i32_28 dim 1 : vector<8x768xf32>, i32 -> vector<8x768xf32>
    %c8_29 = arith.constant 8 : index
    %c0_30 = arith.constant 0 : index
    %55 = vector.load %arg7[%c8_29, %c0_30] : memref<72x768xf32, #tpu.memory_space<vmem>>, vector<8x768xf32>
    tpu.vector_store %arg7[%c8_29, %c0_30], %54 {strides = array<i32>} : memref<72x768xf32, #tpu.memory_space<vmem>>, vector<8x768xf32>,
    %c17_i32_31 = arith.constant 17 : i32
    %56 = tpu.dynamic_rotate %51 by %c17_i32_31 dim 1 : vector<8x768xf32>, i32 -> vector<8x768xf32>
    %c16_32 = arith.constant 16 : index
    %c0_33 = arith.constant 0 : index
    %57 = vector.load %arg7[%c16_32, %c0_33] : memref<72x768xf32, #tpu.memory_space<vmem>>, vector<8x768xf32>
    tpu.vector_store %arg7[%c16_32, %c0_33], %56 {strides = array<i32>} : memref<72x768xf32, #tpu.memory_space<vmem>>, vector<8x768xf32>,
    %c1_i32_34 = arith.constant 1 : i32
    %58 = tpu.dynamic_rotate %51 by %c1_i32_34 dim 1 : vector<8x768xf32>, i32 -> vector<8x768xf32>
    %c24_35 = arith.constant 24 : index
    %c0_36 = arith.constant 0 : index
    %59 = vector.load %arg7[%c24_35, %c0_36] : memref<72x768xf32, #tpu.memory_space<vmem>>, vector<8x768xf32>
    tpu.vector_store %arg7[%c24_35, %c0_36], %58 {strides = array<i32>} : memref<72x768xf32, #tpu.memory_space<vmem>>, vector<8x768xf32>,
    %c32_37 = arith.constant 32 : index
    %c0_38 = arith.constant 0 : index
    %60 = vector.load %arg7[%c32_37, %c0_38] : memref<72x768xf32, #tpu.memory_space<vmem>>, vector<8x768xf32>
    tpu.vector_store %arg7[%c32_37, %c0_38], %51 {strides = array<i32>} : memref<72x768xf32, #tpu.memory_space<vmem>>, vector<8x768xf32>,
    %c767_i32_39 = arith.constant 767 : i32
    %61 = tpu.dynamic_rotate %51 by %c767_i32_39 dim 1 : vector<8x768xf32>, i32 -> vector<8x768xf32>
    %c40_40 = arith.constant 40 : index
    %c0_41 = arith.constant 0 : index
    %62 = vector.load %arg7[%c40_40, %c0_41] : memref<72x768xf32, #tpu.memory_space<vmem>>, vector<8x768xf32>
    tpu.vector_store %arg7[%c40_40, %c0_41], %61 {strides = array<i32>} : memref<72x768xf32, #tpu.memory_space<vmem>>, vector<8x768xf32>,
    %c751_i32_42 = arith.constant 751 : i32
    %63 = tpu.dynamic_rotate %51 by %c751_i32_42 dim 1 : vector<8x768xf32>, i32 -> vector<8x768xf32>
    %c48_43 = arith.constant 48 : index
    %c0_44 = arith.constant 0 : index
    %64 = vector.load %arg7[%c48_43, %c0_44] : memref<72x768xf32, #tpu.memory_space<vmem>>, vector<8x768xf32>
    tpu.vector_store %arg7[%c48_43, %c0_44], %63 {strides = array<i32>} : memref<72x768xf32, #tpu.memory_space<vmem>>, vector<8x768xf32>,
    %c750_i32_45 = arith.constant 750 : i32
    %65 = tpu.dynamic_rotate %51 by %c750_i32_45 dim 1 : vector<8x768xf32>, i32 -> vector<8x768xf32>
    %c56_46 = arith.constant 56 : index
    %c0_47 = arith.constant 0 : index
    %66 = vector.load %arg7[%c56_46, %c0_47] : memref<72x768xf32, #tpu.memory_space<vmem>>, vector<8x768xf32>
    tpu.vector_store %arg7[%c56_46, %c0_47], %65 {strides = array<i32>} : memref<72x768xf32, #tpu.memory_space<vmem>>, vector<8x768xf32>,
    %c749_i32_48 = arith.constant 749 : i32
    %67 = tpu.dynamic_rotate %51 by %c749_i32_48 dim 1 : vector<8x768xf32>, i32 -> vector<8x768xf32>
    %c64_49 = arith.constant 64 : index
    %c0_50 = arith.constant 0 : index
    %68 = vector.load %arg7[%c64_49, %c0_50] : memref<72x768xf32, #tpu.memory_space<vmem>>, vector<8x768xf32>
    tpu.vector_store %arg7[%c64_49, %c0_50], %67 {strides = array<i32>} : memref<72x768xf32, #tpu.memory_space<vmem>>, vector<8x768xf32>,
    %c0_51 = arith.constant 0 : index
    %c0_52 = arith.constant 0 : index
    %69 = vector.load %arg3[%c0_51, %c0_52] : memref<8x72xf32, #tpu.memory_space<vmem>>, vector<8x72xf32>
    %c0_53 = arith.constant 0 : index
    %c0_54 = arith.constant 0 : index
    %70 = vector.load %arg7[%c0_53, %c0_54] : memref<72x768xf32, #tpu.memory_space<vmem>>, vector<72x768xf32>
    %cst_55 = arith.constant dense<0.000000e+00> : vector<8x768xf32>
    %71 = tpu.matmul %69, %70, %cst_55 {dimension_numbers = #tpu.dot_dimension_numbers<[1], [0], [0], [1], [0, 0, 1, 1], [], []>} : vector<8x72xf32>, vector<72x768xf32>, vector<8x768xf32> -> vector<8x768xf32>
    %72 = vector.extract_strided_slice %1 {offsets = [0, 2], sizes = [8, 1], strides = [1, 1]} : vector<8x4xf32> to vector<8x1xf32>
    %73 = vector.extract_strided_slice %1 {offsets = [0, 3], sizes = [8, 1], strides = [1, 1]} : vector<8x4xf32> to vector<8x1xf32>
    %74 = vector.broadcast %0 : vector<1x768xf32> to vector<8x768xf32>
    %75 = arith.mulf %71, %74 : vector<8x768xf32>
    %cst_56 = arith.constant dense<0.000000e+00> : vector<8xf32>
    %76 = vector.multi_reduction <add>, %75, %cst_56 [1] : vector<8x768xf32> to vector<8xf32>
    %77 = vector.shape_cast %76 : vector<8xf32> to vector<8x1xf32>
    %cst_57 = arith.constant 0.001953125 : f32
    %78 = vector.broadcast %cst_57 : f32 to vector<8x1xf32>
    %79 = arith.mulf %77, %78 : vector<8x1xf32>
    %80 = arith.mulf %75, %75 : vector<8x768xf32>
    %cst_58 = arith.constant dense<0.000000e+00> : vector<8xf32>
    %81 = vector.multi_reduction <add>, %80, %cst_58 [1] : vector<8x768xf32> to vector<8xf32>
    %82 = vector.shape_cast %81 : vector<8xf32> to vector<8x1xf32>
    %cst_59 = arith.constant 0.001953125 : f32
    %83 = vector.broadcast %cst_59 : f32 to vector<8x1xf32>
    %84 = arith.mulf %82, %83 : vector<8x1xf32>
    %85 = arith.mulf %79, %79 : vector<8x1xf32>
    %86 = arith.subf %84, %85 : vector<8x1xf32>
    %cst_60 = arith.constant 9.99999974E-6 : f32
    %87 = vector.broadcast %cst_60 : f32 to vector<8x1xf32>
    %88 = arith.addf %86, %87 : vector<8x1xf32>
    %89 = math.rsqrt %88 : vector<8x1xf32>
    %90 = arith.mulf %72, %89 : vector<8x1xf32>
    %91 = arith.mulf %79, %90 : vector<8x1xf32>
    %92 = arith.subf %73, %91 : vector<8x1xf32>
    %93 = vector.broadcast %90 : vector<8x1xf32> to vector<8x768xf32>
    %94 = arith.mulf %71, %93 : vector<8x768xf32>
    %95 = vector.broadcast %92 : vector<8x1xf32> to vector<8x768xf32>
    %96 = arith.addf %94, %95 : vector<8x768xf32>
    %cst_61 = arith.constant 0.000000e+00 : f32
    %97 = vector.broadcast %cst_61 : f32 to vector<8x768xf32>
    %98 = arith.maximumf %96, %97 : vector<8x768xf32>
    %99 = vector.broadcast %0 : vector<1x768xf32> to vector<8x768xf32>
    %100 = arith.mulf %98, %99 : vector<8x768xf32>
    %c0_62 = arith.constant 0 : index
    %c0_63 = arith.constant 0 : index
    %101 = vector.load %arg6[%c0_62, %c0_63] : memref<8x768xf32, #tpu.memory_space<vmem>>, vector<8x768xf32>
    tpu.vector_store %arg6[%c0_62, %c0_63], %100 {strides = array<i32>} : memref<8x768xf32, #tpu.memory_space<vmem>>, vector<8x768xf32>,
    return
  }
  func.func @transform_0(%arg0: i32) -> (i32, i32) {
    %c0_i32 = arith.constant 0 : i32
    %c0_i32_0 = arith.constant 0 : i32
    %c0_i32_1 = arith.constant 0 : i32
    return %c0_i32, %c0_i32_0 : i32, i32
  }
  func.func @transform_1(%arg0: i32) -> (i32, i32) {
    %c0_i32 = arith.constant 0 : i32
    %c0_i32_0 = arith.constant 0 : i32
    %c0_i32_1 = arith.constant 0 : i32
    return %c0_i32, %c0_i32_0 : i32, i32
  }
  func.func @transform_2(%arg0: i32) -> (i32, i32) {
    %c0_i32 = arith.constant 0 : i32
    %c0_i32_0 = arith.constant 0 : i32
    %c0_i32_1 = arith.constant 0 : i32
    return %c0_i32, %c0_i32_0 : i32, i32
  }
  func.func @transform_3(%arg0: i32) -> (i32, i32) {
    %c0_i32 = arith.constant 0 : i32
    %c0_i32_0 = arith.constant 0 : i32
    %c0_i32_1 = arith.constant 0 : i32
    return %c0_i32, %c0_i32_0 : i32, i32
  }
  func.func @transform_4(%arg0: i32) -> (i32, i32) {
    %c0_i32 = arith.constant 0 : i32
    %c0_i32_0 = arith.constant 0 : i32
    %c0_i32_1 = arith.constant 0 : i32
    return %c0_i32, %c0_i32_0 : i32, i32
  }
  func.func @transform_5(%arg0: i32) -> (i32, i32) {
    %c0_i32 = arith.constant 0 : i32
    %c0_i32_0 = arith.constant 0 : i32
    %c0_i32_1 = arith.constant 0 : i32
    return %c0_i32, %c0_i32_0 : i32, i32
  }
}

</mosaic_0001>

<bundles_post_ra>
// kernel: contracting_block_forward.1
= control target key start
LH: loop header
LB: loop body
LE: loop exit
PB: predicated region body
PF: predicated region fallthrough
CT: control target
= control target key end

     0   :  { %s1191_s22 = smov 109   ;;  %s1192_s25 = smov 110   ;;  %v1199_v6 = vmov 0.0   ;;  %v40_v7 = vlaneseq  ;;  %vm291_vm8 = vcmask 588800   ;;  %s1908_s0 = inlined_call_operand.vmem [shape: f32[8,768], index: 0, kind: input, shape index: {}]   ;;  %s1909_s1 = inlined_call_operand.vmem [shape: f32[8,72], index: 1, kind: input, shape index: {}]   ;;  %s1910_s4 = inlined_call_operand.vmem [shape: f32[1,768], index: 4, kind: input, shape index: {}]   ;;  %s1911_s3 = inlined_call_operand.vmem [shape: f32[8,4], index: 3, kind: input, shape index: {}]   ;;  %s1912_s2 = inlined_call_operand.vmem [shape: f32[8,72], index: 2, kind: input, shape index: {}]   ;;  %s1913_s5 = inlined_call_operand.vmem [shape: f32[8,768], index: 5, kind: output, shape index: {}]  }
   0x1   :  { %v1237_v0 = vld [vmem:[%s1908_s0 + $0x8] sm:$0xff]  ;;  %v1242_v1 = vld [vmem:[%s1908_s0] sm:$0xff]  ;;  %v1251_v2 = vld [vmem:[%s1908_s0 + $0x10] sm:$0xff]  ;;  %s1193_s26 = smov 111   ;;  %s1194_s27 = smov 127   ;;  %359 = vmatprep.mubr.f32.mxu0 %v1199_v6  ;;  %430 = vmatprep.mubr.f32.mxu1 %v1199_v6 }
   0x2   :  { %213 = vrot.lane.b32.xlu0 %v1237_v0, %s1191_s22  ;;  %211 = vrot.lane.b32.xlu1 %v1242_v1, %s1191_s22  ;;  %s1195_s28 = smov 1   ;;  %v1280_v3 = vld [vmem:[%s1908_s0 + $0x28] sm:$0xff]  ;;  %s1196_s6 = smov 17   ;;  %v1297_v4 = vld [vmem:[%s1908_s0 + $0x18] sm:$0xff]  ;;  %v1363_v8 = vand.u32 127, %v40_v7 }
   0x3   :  { %s1197_s7 = smov 18   ;;  %v1302_v5 = vld [vmem:[%s1908_s0 + $0x20] sm:$0xff]  ;;  %s1198_s12 = smov 19  }
   0x4   :  { %vm223_vm0 = vcmp.lt.s32.totalorder %v1363_v8, 109  ;;  %vm198_vm1 = vcmp.lt.s32.totalorder %v1363_v8, 110  ;;  %vm173_vm2 = vcmp.lt.s32.totalorder %v1363_v8, 111  ;;  %vm148_vm3 = vcmp.lt.s32.totalorder %v1363_v8, 127  ;;  %v1456_v54 = vld [vmem:[%s1909_s1] sm:$0xff] }
   0x5   :  { %vm117_vm4 = vcmp.lt.s32.totalorder %v1363_v8, 1  ;;  %vm92_vm5 = vcmp.lt.s32.totalorder %v1363_v8, 17  ;;  %vm67_vm6 = vcmp.lt.s32.totalorder %v1363_v8, 18  ;;  %vm42_vm7 = vcmp.lt.s32.totalorder %v1363_v8, 19 }
   0x6   :  { %215 = vrot.lane.b32.xlu0 %v1251_v2, %s1191_s22  ;;  %188 = vrot.lane.b32.xlu1 %v1237_v0, %s1192_s25 }
   0xa   :  { %190 = vrot.lane.b32.xlu0 %v1251_v2, %s1192_s25  ;;  %186 = vrot.lane.b32.xlu1 %v1242_v1, %s1192_s25 }
   0xe   :  { %163 = vrot.lane.b32.xlu0 %v1237_v0, %s1193_s26  ;;  %165 = vrot.lane.b32.xlu1 %v1251_v2, %s1193_s26 }
  0x12   :  { %161 = vrot.lane.b32.xlu0 %v1242_v1, %s1193_s26  ;;  %138 = vrot.lane.b32.xlu1 %v1237_v0, %s1194_s27 }
  0x16   :  { %140 = vrot.lane.b32.xlu0 %v1251_v2, %s1194_s27  ;;  %136 = vrot.lane.b32.xlu1 %v1242_v1, %s1194_s27 }
  0x1a   :  { %105 = vrot.lane.b32.xlu0 %v1242_v1, %s1195_s28  ;;  %107 = vrot.lane.b32.xlu1 %v1237_v0, %s1195_s28 }
  0x1e   :  { %115 = vrot.lane.b32.xlu0 %v1280_v3, %s1195_s28  ;;  %80 = vrot.lane.b32.xlu1 %v1242_v1, %s1196_s6 }
  0x22   :  { %82 = vrot.lane.b32.xlu0 %v1237_v0, %s1196_s6  ;;  %90 = vrot.lane.b32.xlu1 %v1280_v3, %s1196_s6 }
  0x26   :  { %55 = vrot.lane.b32.xlu0 %v1242_v1, %s1197_s7  ;;  %57 = vrot.lane.b32.xlu1 %v1237_v0, %s1197_s7 }
  0x2a   :  { %217 = vrot.lane.b32.xlu0 %v1297_v4, %s1191_s22  ;;  %219 = vrot.lane.b32.xlu1 %v1302_v5, %s1191_s22 }
  0x2e   :  { %65 = vrot.lane.b32.xlu0 %v1280_v3, %s1197_s7  ;;  %28 = vrot.lane.b32.xlu1 %v1242_v1, %s1198_s12 }
  0x32   :  { %30 = vrot.lane.b32.xlu0 %v1237_v0, %s1198_s12  ;;  %192 = vrot.lane.b32.xlu1 %v1297_v4, %s1192_s25 }
  0x36   :  { %194 = vrot.lane.b32.xlu0 %v1302_v5, %s1192_s25  ;;  %38 = vrot.lane.b32.xlu1 %v1280_v3, %s1198_s12 }
  0x3a   :  { %167 = vrot.lane.b32.xlu0 %v1297_v4, %s1193_s26  ;;  %169 = vrot.lane.b32.xlu1 %v1302_v5, %s1193_s26 }
  0x3e   :  { %221 = vrot.lane.b32.xlu0 %v1280_v3, %s1191_s22  ;;  %142 = vrot.lane.b32.xlu1 %v1297_v4, %s1194_s27 }
  0x42   :  { %144 = vrot.lane.b32.xlu0 %v1302_v5, %s1194_s27  ;;  %196 = vrot.lane.b32.xlu1 %v1280_v3, %s1192_s25 }
  0x46   :  { %171 = vrot.lane.b32.xlu0 %v1280_v3, %s1193_s26  ;;  %109 = vrot.lane.b32.xlu1 %v1251_v2, %s1195_s28 }
  0x4a   :  { %111 = vrot.lane.b32.xlu0 %v1297_v4, %s1195_s28  ;;  %146 = vrot.lane.b32.xlu1 %v1280_v3, %s1194_s27 }
  0x4e   :  { %84 = vrot.lane.b32.xlu0 %v1251_v2, %s1196_s6  ;;  %86 = vrot.lane.b32.xlu1 %v1297_v4, %s1196_s6 }
  0x52   :  { %59 = vrot.lane.b32.xlu0 %v1251_v2, %s1197_s7  ;;  %61 = vrot.lane.b32.xlu1 %v1297_v4, %s1197_s7 }
  0x56   :  { %113 = vrot.lane.b32.xlu0 %v1302_v5, %s1195_s28  ;;  %32 = vrot.lane.b32.xlu1 %v1251_v2, %s1198_s12 }
  0x5a   :  { %34 = vrot.lane.b32.xlu0 %v1297_v4, %s1198_s12  ;;  %88 = vrot.lane.b32.xlu1 %v1302_v5, %s1196_s6 }
  0x5e   :  { %63 = vrot.lane.b32.xlu0 %v1302_v5, %s1197_s7  ;;  %36 = vrot.lane.b32.xlu1 %v1302_v5, %s1198_s12 }
  0x74   :  { %v214_v9 = vpop.permute.xlu0 %213  ;;  %v1365_v10 = vpop.permute.xlu1 %211 }
  0x75   :  { %v228_v14 = vsel %vm223_vm0, %v1365_v10, %v214_v9 }
  0x78   :  { %v216_v11 = vpop.permute.xlu0 %215  ;;  %v189_v12 = vpop.permute.xlu1 %188 }
  0x79   :  { %v227_v13 = vsel %vm223_vm0, %v214_v9, %v216_v11 }
  0x7a   :  { %309 = vmatprep.subr.mxu0 %v227_v13 }
  0x7b   :  { %310 = vmatpush1.msra.mxu0 %v228_v14 }
  0x7c   :  { %v1374_v15 = vpop.permute.xlu0 %190  ;;  %v1376_v16 = vpop.permute.xlu1 %186 }
  0x7d   :  { %v202_v17 = vsel %vm198_vm1, %v189_v12, %v1374_v15  ;;  %v203_v18 = vsel %vm198_vm1, %v1376_v16, %v189_v12 }
  0x7e   :  { %311 = vmatprep.subr.mxu0 %v202_v17 }
  0x7f   :  { %312 = vmatpush1.msra.mxu0 %v203_v18 }
  0x80   :  { %v164_v19 = vpop.permute.xlu0 %163  ;;  %v1385_v20 = vpop.permute.xlu1 %165 }
  0x81   :  { %v177_v21 = vsel %vm173_vm2, %v164_v19, %v1385_v20 }
  0x82   :  { %313 = vmatprep.subr.mxu0 %v177_v21 }
  0x84   :  { %v1390_v22 = vpop.permute.xlu0 %161  ;;  %v139_v23 = vpop.permute.xlu1 %138 }
  0x85   :  { %v178_v24 = vsel %vm173_vm2, %v1390_v22, %v164_v19 }
  0x86   :  { %314 = vmatpush1.msra.mxu0 %v178_v24 }
  0x88   :  { %v1396_v25 = vpop.permute.xlu0 %140  ;;  %v1398_v26 = vpop.permute.xlu1 %136 }
  0x89   :  { %v152_v27 = vsel %vm148_vm3, %v139_v23, %v1396_v25  ;;  %v153_v28 = vsel %vm148_vm3, %v1398_v26, %v139_v23 }
  0x8a   :  { %315 = vmatprep.subr.mxu0 %v152_v27 }
  0x8b   :  { %316 = vmatpush1.msra.mxu0 %v153_v28 }
  0x8c   :  { %v106_v29 = vpop.permute.xlu0 %105  ;;  %317 = vmatprep.subr.mxu0 %v1237_v0  ;;  %v1408_v30 = vpop.permute.xlu1 %107 }
  0x8d   :  { %318 = vmatpush1.msra.mxu0 %v1242_v1  ;;  %v122_v31 = vsel %vm117_vm4, %v106_v29, %v1408_v30 }
  0x8e   :  { %319 = vmatprep.subr.mxu0 %v122_v31 }
  0x90   :  { %v1414_v32 = vpop.permute.xlu0 %115  ;;  %v81_v33 = vpop.permute.xlu1 %80 }
  0x91   :  { %v123_v34 = vsel %vm117_vm4, %v1414_v32, %v106_v29 }
  0x92   :  { %320 = vmatpush1.msra.mxu0 %v123_v34 }
  0x94   :  { %v1420_v35 = vpop.permute.xlu0 %82  ;;  %v1422_v36 = vpop.permute.xlu1 %90 }
  0x95   :  { %v97_v37 = vsel %vm92_vm5, %v81_v33, %v1420_v35  ;;  %v98_v38 = vsel %vm92_vm5, %v1422_v36, %v81_v33 }
  0x96   :  { %321 = vmatprep.subr.mxu0 %v97_v37 }
  0x97   :  { %322 = vmatpush1.msra.mxu0 %v98_v38 }
  0x98   :  { %v56_v39 = vpop.permute.xlu0 %55  ;;  %v1431_v40 = vpop.permute.xlu1 %57 }
  0x99   :  { %v72_v41 = vsel %vm67_vm6, %v56_v39, %v1431_v40 }
  0x9a   :  { %323 = vmatprep.subr.mxu0 %v72_v41 }
  0x9c   :  { %v218_v42 = vpop.permute.xlu0 %217  ;;  %v220_v43 = vpop.permute.xlu1 %219 }
  0x9d   :  { %v225_v44 = vsel %vm223_vm0, %v218_v42, %v220_v43  ;;  %v226_v45 = vsel %vm223_vm0, %v216_v11, %v218_v42 }
  0x9e   :  { %380 = vmatprep.subr.mxu1 %v225_v44 }
  0x9f   :  { %381 = vmatpush1.msra.mxu1 %v226_v45  ;;  %v510_v45 = vshrl.u32 %v40_v7, 7 }
  0xa0   :  { %v1440_v46 = vpop.permute.xlu0 %65  ;;  %v29_v47 = vpop.permute.xlu1 %28 }
  0xa1   :  { %v73_v48 = vsel %vm67_vm6, %v1440_v46, %v56_v39  ;;  %v523_v7 = vsub.s32 3, %v510_v45 }
  0xa2   :  { %324 = vmatpush1.msra.mxu0 %v73_v48  ;;  %v20_v48 = vld [vmem:[%s1910_s4] sm:$0x3f] }
  0xa4   :  { %v1446_v49 = vpop.permute.xlu0 %30  ;;  %v193_v50 = vpop.permute.xlu1 %192 }
  0xa5   :  { %v47_v51 = vsel %vm42_vm7, %v29_v47, %v1446_v49  ;;  %v201_v57 = vsel %vm198_vm1, %v1374_v15, %v193_v50 }
  0xa6   :  { %325 = vmatprep.subr.mxu0 %v47_v51 }
  0xa8   :  { %v195_v52 = vpop.permute.xlu0 %194  ;;  %v1451_v53 = vpop.permute.xlu1 %38 }
  0xa9   :  { %v48_v55 = vsel %vm42_vm7, %v1451_v53, %v29_v47  ;;  %v200_v56 = vsel %vm198_vm1, %v193_v50, %v195_v52  ;;  %v515_v47 = vsub.s32 1, %v510_v45 }
  0xaa   :  { %326 = vmatpush1.msra.mxu0 %v48_v55  ;;  %382 = vmatprep.subr.mxu1 %v200_v56 }
  0xab   :  { %383 = vmatpush1.msra.mxu1 %v201_v57  ;;  %1164 = vmatmul.mubr.msk.f32.vlgmr.msra.gmra.mxu0 %vm291_vm8, %v1456_v54  ;;  %v1557_v51 = vrot.slane %v20_v48, %v515_v47  ;;  %v527_v57 = vsub.s32 4, %v510_v45 }
  0xac   :  { %v168_v58 = vpop.permute.xlu0 %167  ;;  %v170_v59 = vpop.permute.xlu1 %169  ;;  %501 = vmatprep.mubr.f32.mxu0 %v1199_v6 }
  0xad   :  { %v175_v60 = vsel %vm173_vm2, %v168_v58, %v170_v59  ;;  %v176_v61 = vsel %vm173_vm2, %v1385_v20, %v168_v58 }
  0xae   :  { %384 = vmatprep.subr.mxu1 %v175_v60  ;;  %v1564_v60 = vrot.slane %v20_v48, %v523_v7 }
  0xaf   :  { %385 = vmatpush1.msra.mxu1 %v176_v61 }
  0xb0   :  { %v222_v62 = vpop.permute.xlu0 %221  ;;  %v143_v63 = vpop.permute.xlu1 %142 }
  0xb1   :  { %v224_v0 = vsel %vm223_vm0, %v220_v43, %v222_v62  ;;  %v229_v1 = vsel %vm223_vm0, %v222_v62, %v1365_v10  ;;  %v151_v10 = vsel %vm148_vm3, %v1396_v25, %v143_v63 }
  0xb2   :  { %451 = vmatprep.subr.mxu0 %v229_v1 }
  0xb3   :  { %452 = vmatpush1.msra.mxu0 %v224_v0  ;;  %v531_v0 = vsub.s32 5, %v510_v45 }
  0xb4   :  { %v145_v9 = vpop.permute.xlu0 %144  ;;  %v197_v11 = vpop.permute.xlu1 %196 }
  0xb5   :  { %v199_v12 = vsel %vm198_vm1, %v195_v52, %v197_v11  ;;  %v150_v13 = vsel %vm148_vm3, %v143_v63, %v145_v9  ;;  %v204_v14 = vsel %vm198_vm1, %v197_v11, %v1376_v16 }
  0xb6   :  { %386 = vmatprep.subr.mxu1 %v150_v13  ;;  %453 = vmatprep.subr.mxu0 %v204_v14 }
  0xb7   :  { %387 = vmatpush1.msra.mxu1 %v151_v10  ;;  %454 = vmatpush1.msra.mxu0 %v199_v12 }
  0xb8   :  { %v172_v15 = vpop.permute.xlu0 %171  ;;  %v110_v17 = vpop.permute.xlu1 %109  ;;  %388 = vmatprep.subr.mxu1 %v1297_v4 }
  0xb9   :  { %v174_v18 = vsel %vm173_vm2, %v170_v59, %v172_v15  ;;  %v179_v19 = vsel %vm173_vm2, %v172_v15, %v1390_v22  ;;  %389 = vmatpush1.msra.mxu1 %v1251_v2  ;;  %v121_v2 = vsel %vm117_vm4, %v1408_v30, %v110_v17 }
  0xba   :  { %455 = vmatprep.subr.mxu0 %v179_v19 }
  0xbb   :  { %456 = vmatpush1.msra.mxu0 %v174_v18 }
  0xbc   :  { %v112_v16 = vpop.permute.xlu0 %111  ;;  %v147_v20 = vpop.permute.xlu1 %146 }
  0xbd   :  { %v149_v21 = vsel %vm148_vm3, %v145_v9, %v147_v20  ;;  %v120_v23 = vsel %vm117_vm4, %v110_v17, %v112_v16  ;;  %v154_v4 = vsel %vm148_vm3, %v147_v20, %v1398_v26  ;;  %v1569_v9 = vrot.slane %v20_v48, %v527_v57 }
  0xbe   :  { %390 = vmatprep.subr.mxu1 %v120_v23  ;;  %457 = vmatprep.subr.mxu0 %v154_v4  ;;  %v1573_v17 = vrot.slane %v20_v48, %v531_v0 }
  0xbf   :  { %391 = vmatpush1.msra.mxu1 %v121_v2  ;;  %458 = vmatpush1.msra.mxu0 %v149_v21 }
  0xc0   :  { %v85_v22 = vpop.permute.xlu0 %84  ;;  %v87_v24 = vpop.permute.xlu1 %86  ;;  %459 = vmatprep.subr.mxu0 %v1280_v3 }
  0xc1   :  { %v95_v25 = vsel %vm92_vm5, %v85_v22, %v87_v24  ;;  %v96_v27 = vsel %vm92_vm5, %v1420_v35, %v85_v22  ;;  %460 = vmatpush1.msra.mxu0 %v1302_v5 }
  0xc2   :  { %392 = vmatprep.subr.mxu1 %v95_v25 }
  0xc3   :  { %393 = vmatpush1.msra.mxu1 %v96_v27 }
  0xc4   :  { %v60_v26 = vpop.permute.xlu0 %59  ;;  %v62_v28 = vpop.permute.xlu1 %61 }
  0xc5   :  { %v70_v29 = vsel %vm67_vm6, %v60_v26, %v62_v28  ;;  %v71_v3 = vsel %vm67_vm6, %v1431_v40, %v60_v26  ;;  %v1200_v26 = vmov 0  }
  0xc6   :  { %394 = vmatprep.subr.mxu1 %v70_v29  ;;  %1183 = vset.pattern.permute.xlu1 %v1200_v26 }
  0xc7   :  { %395 = vmatpush1.msra.mxu1 %v71_v3 }
  0xc8   :  { %v114_v30 = vpop.permute.xlu0 %113  ;;  %v33_v31 = vpop.permute.xlu1 %32 }
  0xc9   :  { %v119_v33 = vsel %vm117_vm4, %v112_v16, %v114_v30  ;;  %v118_v5 = vsel %vm117_vm4, %v114_v30, %v1414_v32  ;;  %v46_v32 = vsel %vm42_vm7, %v1446_v49, %v33_v31 }
  0xca   :  { %461 = vmatprep.subr.mxu0 %v118_v5 }
  0xcb   :  { %462 = vmatpush1.msra.mxu0 %v119_v33 }
  0xcc   :  { %v35_v34 = vpop.permute.xlu0 %34  ;;  %v89_v35 = vpop.permute.xlu1 %88 }
  0xcd   :  { %v94_v37 = vsel %vm92_vm5, %v87_v24, %v89_v35  ;;  %v45_v38 = vsel %vm42_vm7, %v33_v31, %v35_v34  ;;  %v93_v39 = vsel %vm92_vm5, %v89_v35, %v1422_v36  ;;  %v1583_v35 = vld [vmem:[%s1911_s3] sm:$0xff] }
  0xce   :  { %396 = vmatprep.subr.mxu1 %v45_v38  ;;  %463 = vmatprep.subr.mxu0 %v93_v39 }
  0xcf   :  { %397 = vmatpush1.msra.mxu1 %v46_v32  ;;  %464 = vmatpush1.msra.mxu0 %v94_v37 }
  0xd0   :  { %v64_v40 = vpop.permute.xlu0 %63  ;;  %1165 = vmatmul.mubr.msk.f32.vlgmr.msra.gmra.mxu1 %vm291_vm8, %v1456_v54  ;;  %v37_v41 = vpop.permute.xlu1 %36 }
  0xd1   :  { %v69_v42 = vsel %vm67_vm6, %v62_v28, %v64_v40  ;;  %v68_v36 = vsel %vm67_vm6, %v64_v40, %v1440_v46  ;;  %932 = vmatprep.mubr.f32.mxu1 %v1199_v6  ;;  %v43_v43 = vsel %vm42_vm7, %v37_v41, %v1451_v53  ;;  %v44_v44 = vsel %vm42_vm7, %v35_v34, %v37_v41 }
  0xd2   :  { %465 = vmatprep.subr.mxu0 %v68_v36  ;;  %v511_v46 = vsub.s32 0, %v510_v45  ;;  %v519_v53 = vsub.s32 2, %v510_v45  ;;  %v1201_v34 = vmov 1  }
  0xd3   :  { %466 = vmatpush1.msra.mxu0 %v69_v42  ;;  %1184 = vset.pattern.permute.xlu0 %v1201_v34 }
  0xd4   :  { %467 = vmatprep.subr.mxu0 %v43_v43  ;;  %v1555_v50 = vrot.slane %v20_v48, %v511_v46  ;;  %v1562_v56 = vrot.slane %v20_v48, %v519_v53 }
  0xd5   :  { %468 = vmatpush1.msra.mxu0 %v44_v44 }
  0xd6   :  { %1166 = vmatmul.mubr.msk.f32.vlgmr.msra.gmra.mxu0 %vm291_vm8, %v1456_v54 }
  0xd7   :  { %1003 = vmatprep.mubr.f32.mxu0 %v1199_v6 }
 0x16b   :  { %v1553_v49 = vpop.f32.mrf.mxu0 }
 0x16c   :  { %v539_v54 = vmul.f32 %v1555_v50, %v1553_v49 }
 0x16d   :  { %v363_v52 = vpop.f32.mrf.mxu0 }
 0x16e   :  { %v540_v55 = vmul.f32 %v1557_v51, %v363_v52  ;;  %v553_v58 = vmul.f32 %v539_v54, %v539_v54 }
 0x170   :  { %v554_v59 = vmul.f32 %v540_v55, %v540_v55  ;;  %v545_v62 = vadd.f32 %v540_v55, %v539_v54 }
 0x172   :  { %v559_v11 = vadd.f32 %v554_v59, %v553_v58 }
 0x190   :  { %v432_v61 = vpop.f32.mrf.mxu1 }
 0x191   :  { %v541_v63 = vmul.f32 %v1562_v56, %v432_v61 }
 0x192   :  { %v1567_v1 = vpop.f32.mrf.mxu1 }
 0x193   :  { %v546_v12 = vadd.f32 %v545_v62, %v541_v63  ;;  %v555_v13 = vmul.f32 %v541_v63, %v541_v63  ;;  %v542_v14 = vmul.f32 %v1564_v60, %v1567_v1 }
 0x195   :  { %v560_v10 = vadd.f32 %v559_v11, %v555_v13  ;;  %v556_v15 = vmul.f32 %v542_v14, %v542_v14  ;;  %v547_v19 = vadd.f32 %v546_v12, %v542_v14 }
 0x196   :  { %v1575_v18 = vpop.f32.mrf.mxu0 }
 0x197   :  { %v543_v16 = vmul.f32 %v1569_v9, %v1575_v18  ;;  %v561_v2 = vadd.f32 %v560_v10, %v556_v15 }
 0x198   :  { %v505_v20 = vpop.f32.mrf.mxu0 }
 0x199   :  { %v557_v21 = vmul.f32 %v543_v16, %v543_v16  ;;  %v544_v23 = vmul.f32 %v1573_v17, %v505_v20  ;;  %v548_v4 = vadd.f32 %v547_v19, %v543_v16 }
 0x19b   :  { %v549_v22 = vadd.f32 %v548_v4, %v544_v23  ;;  %v558_v24 = vmul.f32 %v544_v23, %v544_v23  ;;  %v562_v25 = vadd.f32 %v561_v2, %v557_v21 }
 0x19d   :  { %550 = vadd.xlane.f32.xlu0 %v549_v22  ;;  %v563_v27 = vadd.f32 %v562_v25, %v558_v24 }
 0x19f   :  { %564 = vadd.xlane.f32.xlu1 %v563_v27 }
 0x226   :  { %v551_v28 = vpop.xlane.xlu0 %550 }
 0x227   :  { %v552_v29 = vmul.f32 0.001953125, %v551_v28 }
 0x228   :  { %v565_v3 = vpop.xlane.xlu1 %564 }
 0x229   :  { %v567_v30 = vmul.f32 %v552_v29, %v552_v29  ;;  %v566_v31 = vmul.f32 0.001953125, %v565_v3 }
 0x22b   :  { %v568_v33 = vsub.f32 %v566_v31, %v567_v30 }
 0x22d   :  { %v569_v5 = vadd.f32 1e-05, %v568_v33 }
 0x22f   :  { %1187 = vrsqrt.f32 %v569_v5 }
 0x23c   :  { %v1188_v37 = vpop.eup %1187 }
 0x23d   :  { %v571_v38 = vmul.f32 %v1188_v37, %v1583_v35 }
 0x23f   :  { %580 = vperm.xlu1 %1183, %v571_v38   ;;  %v572_v39 = vmul.f32 %v571_v38, %v552_v29 }
 0x241   :  { %574 = vrot.lane.b32.xlu0 %v572_v39, %s1195_s28 }
 0x2b3   :  { %v575_v32 = vpop.permute.xlu0 %574 }
 0x2b4   :  { %v577_v40 = vsub.f32 %v1583_v35, %v575_v32 }
 0x2b6   :  { %591 = vperm.xlu0 %1184, %v577_v40  }
 0x2ba   :  { %v581_v41 = vpop.permute.xlu1 %580 }
 0x2bb   :  { %v583_v42 = vmul.f32 %v581_v41, %v1553_v49  ;;  %v584_v36 = vmul.f32 %v581_v41, %v363_v52  ;;  %v585_v43 = vmul.f32 %v581_v41, %v432_v61  ;;  %v588_v52 = vmul.f32 %v581_v41, %v505_v20 }
 0x2bc   :  { %v586_v61 = vmul.f32 %v581_v41, %v1567_v1  ;;  %v587_v0 = vmul.f32 %v581_v41, %v1575_v18 }
 0x331   :  { %v592_v44 = vpop.permute.xlu0 %591 }
 0x332   :  { %v594_v45 = vadd.f32 %v592_v44, %v583_v42  ;;  %v595_v46 = vadd.f32 %v592_v44, %v584_v36  ;;  %v596_v47 = vadd.f32 %v592_v44, %v585_v43  ;;  %v599_v57 = vadd.f32 %v592_v44, %v588_v52 }
 0x333   :  { %v597_v62 = vadd.f32 %v592_v44, %v586_v61  ;;  %v598_v1 = vadd.f32 %v592_v44, %v587_v0 }
 0x334   :  { %v600_v48 = vmax.f32 %v594_v45, 0.0  ;;  %v601_v53 = vmax.f32 %v595_v46, 0.0  ;;  %v602_v54 = vmax.f32 %v596_v47, 0.0  ;;  %v605_v58 = vmax.f32 %v599_v57, 0.0 }
 0x335   :  { %v603_v63 = vmax.f32 %v597_v62, 0.0  ;;  %v604_v12 = vmax.f32 %v598_v1, 0.0  ;;  %v1789_v1 = vld [vmem:[%s1912_s2] sm:$0xff] }
 0x336   :  { %v1590_v55 = vmul.f32 %v600_v48, %v1555_v50  ;;  %v1593_v7 = vmul.f32 %v601_v53, %v1557_v51  ;;  %v1600_v49 = vmul.f32 %v602_v54, %v1562_v56  ;;  %v1623_v59 = vmul.f32 %v605_v58, %v1573_v17 }
 0x337   :  { %v1640_v11 = vmul.f32 %v603_v63, %v1564_v60  ;;  %v1651_v13 = vmul.f32 %v604_v12, %v1569_v9 }
 0x338   :  { %788 = vrot.lane.b32.xlu1 %v1593_v7, %s1191_s22  ;;  %786 = vrot.lane.b32.xlu0 %v1590_v55, %s1191_s22 }
 0x33c   :  { %790 = vrot.lane.b32.xlu1 %v1600_v49, %s1191_s22  ;;  %766 = vrot.lane.b32.xlu0 %v1600_v49, %s1192_s25 }
 0x340   :  { %764 = vrot.lane.b32.xlu1 %v1593_v7, %s1192_s25  ;;  %740 = vrot.lane.b32.xlu0 %v1593_v7, %s1193_s26 }
 0x344   :  { %762 = vrot.lane.b32.xlu1 %v1590_v55, %s1192_s25  ;;  %738 = vrot.lane.b32.xlu0 %v1590_v55, %s1193_s26 }
 0x348   :  { %742 = vrot.lane.b32.xlu1 %v1600_v49, %s1193_s26  ;;  %718 = vrot.lane.b32.xlu0 %v1600_v49, %s1194_s27 }
 0x34c   :  { %716 = vrot.lane.b32.xlu1 %v1593_v7, %s1194_s27  ;;  %684 = vrot.lane.b32.xlu0 %v1590_v55, %s1195_s28 }
 0x350   :  { %714 = vrot.lane.b32.xlu1 %v1590_v55, %s1194_s27  ;;  %694 = vrot.lane.b32.xlu0 %v1623_v59, %s1195_s28 }
 0x354   :  { %686 = vrot.lane.b32.xlu1 %v1593_v7, %s1195_s28  ;;  %662 = vrot.lane.b32.xlu0 %v1593_v7, %s1196_s6 }
 0x358   :  { %660 = vrot.lane.b32.xlu1 %v1590_v55, %s1196_s6  ;;  %636 = vrot.lane.b32.xlu0 %v1590_v55, %s1197_s7 }
 0x35c   :  { %670 = vrot.lane.b32.xlu1 %v1623_v59, %s1196_s6  ;;  %792 = vrot.lane.b32.xlu0 %v1640_v11, %s1191_s22 }
 0x360   :  { %638 = vrot.lane.b32.xlu1 %v1593_v7, %s1197_s7  ;;  %646 = vrot.lane.b32.xlu0 %v1623_v59, %s1197_s7 }
 0x364   :  { %794 = vrot.lane.b32.xlu1 %v1651_v13, %s1191_s22  ;;  %614 = vrot.lane.b32.xlu0 %v1593_v7, %s1198_s12 }
 0x368   :  { %612 = vrot.lane.b32.xlu1 %v1590_v55, %s1198_s12  ;;  %770 = vrot.lane.b32.xlu0 %v1651_v13, %s1192_s25 }
 0x36c   :  { %768 = vrot.lane.b32.xlu1 %v1640_v11, %s1192_s25  ;;  %744 = vrot.lane.b32.xlu0 %v1640_v11, %s1193_s26 }
 0x370   :  { %622 = vrot.lane.b32.xlu1 %v1623_v59, %s1198_s12  ;;  %796 = vrot.lane.b32.xlu0 %v1623_v59, %s1191_s22 }
 0x374   :  { %746 = vrot.lane.b32.xlu1 %v1651_v13, %s1193_s26  ;;  %722 = vrot.lane.b32.xlu0 %v1651_v13, %s1194_s27 }
 0x378   :  { %720 = vrot.lane.b32.xlu1 %v1640_v11, %s1194_s27  ;;  %748 = vrot.lane.b32.xlu0 %v1623_v59, %s1193_s26 }
 0x37c   :  { %772 = vrot.lane.b32.xlu1 %v1623_v59, %s1192_s25  ;;  %690 = vrot.lane.b32.xlu0 %v1640_v11, %s1195_s28 }
 0x380   :  { %688 = vrot.lane.b32.xlu1 %v1600_v49, %s1195_s28  ;;  %664 = vrot.lane.b32.xlu0 %v1600_v49, %s1196_s6 }
 0x384   :  { %724 = vrot.lane.b32.xlu1 %v1623_v59, %s1194_s27  ;;  %640 = vrot.lane.b32.xlu0 %v1600_v49, %s1197_s7 }
 0x388   :  { %666 = vrot.lane.b32.xlu1 %v1640_v11, %s1196_s6  ;;  %692 = vrot.lane.b32.xlu0 %v1651_v13, %s1195_s28 }
 0x38c   :  { %642 = vrot.lane.b32.xlu1 %v1640_v11, %s1197_s7  ;;  %618 = vrot.lane.b32.xlu0 %v1640_v11, %s1198_s12 }
 0x390   :  { %616 = vrot.lane.b32.xlu1 %v1600_v49, %s1198_s12  ;;  %644 = vrot.lane.b32.xlu0 %v1651_v13, %s1197_s7 }
 0x394   :  { %668 = vrot.lane.b32.xlu1 %v1651_v13, %s1196_s6 }
 0x398   :  { %620 = vrot.lane.b32.xlu1 %v1651_v13, %s1198_s12 }
 0x3aa   :  { %v789_v14 = vpop.permute.xlu1 %788  ;;  %v1705_v10 = vpop.permute.xlu0 %786 }
 0x3ab   :  { %v802_v16 = vsel %vm223_vm0, %v1705_v10, %v789_v14 }
 0x3ae   :  { %v791_v15 = vpop.permute.xlu1 %790  ;;  %v767_v18 = vpop.permute.xlu0 %766 }
 0x3af   :  { %v801_v19 = vsel %vm223_vm0, %v789_v14, %v791_v15 }
 0x3b0   :  { %882 = vmatprep.subr.mxu1 %v801_v19 }
 0x3b1   :  { %883 = vmatpush1.msra.mxu1 %v802_v16 }
 0x3b2   :  { %v765_v20 = vpop.permute.xlu1 %764  ;;  %v741_v21 = vpop.permute.xlu0 %740 }
 0x3b3   :  { %v777_v23 = vsel %vm198_vm1, %v765_v20, %v767_v18 }
 0x3b4   :  { %884 = vmatprep.subr.mxu1 %v777_v23 }
 0x3b6   :  { %v1714_v4 = vpop.permute.xlu1 %762  ;;  %v1716_v2 = vpop.permute.xlu0 %738 }
 0x3b7   :  { %v778_v22 = vsel %vm198_vm1, %v1714_v4, %v765_v20  ;;  %v754_v26 = vsel %vm173_vm2, %v1716_v2, %v741_v21 }
 0x3b8   :  { %885 = vmatpush1.msra.mxu1 %v778_v22 }
 0x3ba   :  { %v1721_v24 = vpop.permute.xlu1 %742  ;;  %v1723_v25 = vpop.permute.xlu0 %718 }
 0x3bb   :  { %v753_v27 = vsel %vm173_vm2, %v741_v21, %v1721_v24 }
 0x3bc   :  { %886 = vmatprep.subr.mxu1 %v753_v27 }
 0x3bd   :  { %887 = vmatpush1.msra.mxu1 %v754_v26 }
 0x3be   :  { %v717_v28 = vpop.permute.xlu1 %716  ;;  %v685_v29 = vpop.permute.xlu0 %684 }
 0x3bf   :  { %v729_v3 = vsel %vm148_vm3, %v717_v28, %v1723_v25 }
 0x3c0   :  { %888 = vmatprep.subr.mxu1 %v729_v3 }
 0x3c2   :  { %v1734_v30 = vpop.permute.xlu1 %714  ;;  %v1736_v31 = vpop.permute.xlu0 %694 }
 0x3c3   :  { %v730_v33 = vsel %vm148_vm3, %v1734_v30, %v717_v28  ;;  %v701_v38 = vsel %vm117_vm4, %v1736_v31, %v685_v29 }
 0x3c4   :  { %889 = vmatpush1.msra.mxu1 %v730_v33 }
 0x3c5   :  { %890 = vmatprep.subr.mxu1 %v1593_v7 }
 0x3c6   :  { %v1742_v5 = vpop.permute.xlu1 %686  ;;  %891 = vmatpush1.msra.mxu1 %v1590_v55  ;;  %v1745_v34 = vpop.permute.xlu0 %662 }
 0x3c7   :  { %v700_v37 = vsel %vm117_vm4, %v685_v29, %v1742_v5 }
 0x3c8   :  { %892 = vmatprep.subr.mxu1 %v700_v37 }
 0x3c9   :  { %893 = vmatpush1.msra.mxu1 %v701_v38 }
 0x3ca   :  { %v661_v39 = vpop.permute.xlu1 %660  ;;  %v637_v32 = vpop.permute.xlu0 %636 }
 0x3cb   :  { %v676_v40 = vsel %vm92_vm5, %v661_v39, %v1745_v34 }
 0x3cc   :  { %894 = vmatprep.subr.mxu1 %v676_v40 }
 0x3ce   :  { %v1756_v41 = vpop.permute.xlu1 %670  ;;  %v793_v42 = vpop.permute.xlu0 %792 }
 0x3cf   :  { %v677_v36 = vsel %vm92_vm5, %v1756_v41, %v661_v39  ;;  %v800_v54 = vsel %vm223_vm0, %v791_v15, %v793_v42 }
 0x3d0   :  { %895 = vmatpush1.msra.mxu1 %v677_v36 }
 0x3d2   :  { %v1761_v43 = vpop.permute.xlu1 %638  ;;  %v1763_v44 = vpop.permute.xlu0 %646 }
 0x3d3   :  { %v653_v45 = vsel %vm67_vm6, %v1763_v44, %v637_v32  ;;  %v652_v46 = vsel %vm67_vm6, %v637_v32, %v1761_v43 }
 0x3d4   :  { %896 = vmatprep.subr.mxu1 %v652_v46 }
 0x3d5   :  { %897 = vmatpush1.msra.mxu1 %v653_v45 }
 0x3d6   :  { %v795_v47 = vpop.permute.xlu1 %794  ;;  %v1771_v48 = vpop.permute.xlu0 %614 }
 0x3d7   :  { %v799_v53 = vsel %vm223_vm0, %v793_v42, %v795_v47 }
 0x3d8   :  { %953 = vmatprep.subr.mxu0 %v799_v53 }
 0x3d9   :  { %954 = vmatpush1.msra.mxu0 %v800_v54 }
 0x3da   :  { %v613_v55 = vpop.permute.xlu1 %612  ;;  %v771_v7 = vpop.permute.xlu0 %770 }
 0x3db   :  { %v628_v52 = vsel %vm42_vm7, %v613_v55, %v1771_v48 }
 0x3dc   :  { %898 = vmatprep.subr.mxu1 %v628_v52 }
 0x3de   :  { %v769_v57 = vpop.permute.xlu1 %768  ;;  %v745_v58 = vpop.permute.xlu0 %744 }
 0x3df   :  { %v776_v61 = vsel %vm198_vm1, %v767_v18, %v769_v57  ;;  %v775_v62 = vsel %vm198_vm1, %v769_v57, %v771_v7 }
 0x3e0   :  { %955 = vmatprep.subr.mxu0 %v775_v62 }
 0x3e1   :  { %956 = vmatpush1.msra.mxu0 %v776_v61 }
 0x3e2   :  { %v1784_v63 = vpop.permute.xlu1 %622  ;;  %v797_v0 = vpop.permute.xlu0 %796 }
 0x3e3   :  { %v629_v12 = vsel %vm42_vm7, %v1784_v63, %v613_v55  ;;  %v803_v14 = vsel %vm223_vm0, %v797_v0, %v1705_v10  ;;  %v798_v15 = vsel %vm223_vm0, %v795_v47, %v797_v0  ;;  %v752_v10 = vsel %vm173_vm2, %v1721_v24, %v745_v58 }
 0x3e4   :  { %899 = vmatpush1.msra.mxu1 %v629_v12 }
 0x3e5   :  { %1024 = vmatprep.subr.mxu1 %v803_v14  ;;  %1167 = vmatmul.mubr.msk.f32.vlgmr.msra.gmra.mxu1 %vm291_vm8, %v1789_v1 }
 0x3e6   :  { %v747_v18 = vpop.permute.xlu1 %746  ;;  %1025 = vmatpush1.msra.mxu1 %v798_v15  ;;  %v723_v19 = vpop.permute.xlu0 %722  ;;  %1074 = vmatprep.mubr.f32.mxu1 %v1199_v6 }
 0x3e7   :  { %v751_v16 = vsel %vm173_vm2, %v745_v58, %v747_v18 }
 0x3e8   :  { %957 = vmatprep.subr.mxu0 %v751_v16 }
 0x3e9   :  { %958 = vmatpush1.msra.mxu0 %v752_v10 }
 0x3ea   :  { %v721_v20 = vpop.permute.xlu1 %720  ;;  %v749_v21 = vpop.permute.xlu0 %748 }
 0x3eb   :  { %v728_v23 = vsel %vm148_vm3, %v1723_v25, %v721_v20  ;;  %v727_v22 = vsel %vm148_vm3, %v721_v20, %v723_v19  ;;  %v755_v25 = vsel %vm173_vm2, %v749_v21, %v1716_v2  ;;  %v750_v28 = vsel %vm173_vm2, %v747_v18, %v749_v21 }
 0x3ec   :  { %959 = vmatprep.subr.mxu0 %v727_v22 }
 0x3ed   :  { %960 = vmatpush1.msra.mxu0 %v728_v23 }
 0x3ee   :  { %v773_v6 = vpop.permute.xlu1 %772  ;;  %961 = vmatprep.subr.mxu0 %v1640_v11  ;;  %v691_v27 = vpop.permute.xlu0 %690 }
 0x3ef   :  { %v774_v24 = vsel %vm198_vm1, %v771_v7, %v773_v6  ;;  %962 = vmatpush1.msra.mxu0 %v1600_v49  ;;  %v779_v26 = vsel %vm198_vm1, %v773_v6, %v1714_v4 }
 0x3f0   :  { %1026 = vmatprep.subr.mxu1 %v779_v26 }
 0x3f1   :  { %1027 = vmatpush1.msra.mxu1 %v774_v24 }
 0x3f2   :  { %v689_v11 = vpop.permute.xlu1 %688  ;;  %1028 = vmatprep.subr.mxu1 %v755_v25  ;;  %v665_v29 = vpop.permute.xlu0 %664 }
 0x3f3   :  { %v699_v49 = vsel %vm117_vm4, %v1742_v5, %v689_v11  ;;  %1029 = vmatpush1.msra.mxu1 %v750_v28  ;;  %v698_v4 = vsel %vm117_vm4, %v689_v11, %v691_v27 }
 0x3f4   :  { %963 = vmatprep.subr.mxu0 %v698_v4 }
 0x3f5   :  { %964 = vmatpush1.msra.mxu0 %v699_v49 }
 0x3f6   :  { %v725_v3 = vpop.permute.xlu1 %724  ;;  %v641_v33 = vpop.permute.xlu0 %640 }
 0x3f7   :  { %v726_v2 = vsel %vm148_vm3, %v723_v19, %v725_v3  ;;  %v731_v37 = vsel %vm148_vm3, %v725_v3, %v1734_v30  ;;  %v675_v30 = vsel %vm92_vm5, %v1745_v34, %v665_v29 }
 0x3f8   :  { %1030 = vmatprep.subr.mxu1 %v731_v37 }
 0x3f9   :  { %1031 = vmatpush1.msra.mxu1 %v726_v2 }
 0x3fa   :  { %v667_v38 = vpop.permute.xlu1 %666  ;;  %1032 = vmatprep.subr.mxu1 %v1623_v59  ;;  %v693_v5 = vpop.permute.xlu0 %692 }
 0x3fb   :  { %v697_v39 = vsel %vm117_vm4, %v691_v27, %v693_v5  ;;  %1033 = vmatpush1.msra.mxu1 %v1651_v13  ;;  %v674_v32 = vsel %vm92_vm5, %v665_v29, %v667_v38  ;;  %v696_v40 = vsel %vm117_vm4, %v693_v5, %v1736_v31  ;;  %v651_v13 = vsel %vm67_vm6, %v1761_v43, %v641_v33 }
 0x3fc   :  { %965 = vmatprep.subr.mxu0 %v674_v32  ;;  %1034 = vmatprep.subr.mxu1 %v696_v40  ;;  %v1202_v29 = vmov 2   ;;  %v1203_v5 = vmov 3  }
 0x3fd   :  { %966 = vmatpush1.msra.mxu0 %v675_v30  ;;  %1035 = vmatpush1.msra.mxu1 %v697_v39 }
 0x3fe   :  { %v643_v59 = vpop.permute.xlu1 %642  ;;  %v619_v36 = vpop.permute.xlu0 %618  ;;  %1185 = vset.pattern.permute.xlu1 %v1202_v29  ;;  %1186 = vset.pattern.permute.xlu0 %v1203_v5 }
 0x3ff   :  { %v650_v42 = vsel %vm67_vm6, %v641_v33, %v643_v59 }
 0x400   :  { %967 = vmatprep.subr.mxu0 %v650_v42 }
 0x401   :  { %968 = vmatpush1.msra.mxu0 %v651_v13 }
 0x402   :  { %v617_v31 = vpop.permute.xlu1 %616  ;;  %v645_v46 = vpop.permute.xlu0 %644 }
 0x403   :  { %v627_v34 = vsel %vm42_vm7, %v1771_v48, %v617_v31  ;;  %v626_v45 = vsel %vm42_vm7, %v617_v31, %v619_v36  ;;  %v648_v48 = vsel %vm67_vm6, %v645_v46, %v1763_v44  ;;  %v649_v54 = vsel %vm67_vm6, %v643_v59, %v645_v46 }
 0x404   :  { %969 = vmatprep.subr.mxu0 %v626_v45 }
 0x405   :  { %970 = vmatpush1.msra.mxu0 %v627_v34 }
 0x406   :  { %v669_v47 = vpop.permute.xlu1 %668  ;;  %1168 = vmatmul.mubr.msk.f32.vlgmr.msra.gmra.mxu0 %vm291_vm8, %v1789_v1 }
 0x407   :  { %v673_v43 = vsel %vm92_vm5, %v667_v38, %v669_v47  ;;  %v672_v53 = vsel %vm92_vm5, %v669_v47, %v1756_v41 }
 0x408   :  { %1036 = vmatprep.subr.mxu1 %v672_v53 }
 0x409   :  { %1037 = vmatpush1.msra.mxu1 %v673_v43 }
 0x40a   :  { %v621_v55 = vpop.permute.xlu1 %620  ;;  %1038 = vmatprep.subr.mxu1 %v648_v48 }
 0x40b   :  { %v625_v7 = vsel %vm42_vm7, %v619_v36, %v621_v55  ;;  %1039 = vmatpush1.msra.mxu1 %v649_v54  ;;  %v624_v52 = vsel %vm42_vm7, %v621_v55, %v1784_v63 }
 0x40c   :  { %1040 = vmatprep.subr.mxu1 %v624_v52 }
 0x40d   :  { %1041 = vmatpush1.msra.mxu1 %v625_v7 }
 0x40e   :  { %1169 = vmatmul.mubr.msk.f32.vlgmr.msra.gmra.mxu1 %vm291_vm8, %v1789_v1 }
 0x4a5   :  { %v934_v41 = vpop.f32.mrf.mxu1 }
 0x4a6   :  { %v1081_v57 = vmul.f32 %v934_v41, %v1555_v50 }
 0x4a7   :  { %v936_v44 = vpop.f32.mrf.mxu1 }
 0x4a8   :  { %v1082_v58 = vmul.f32 %v936_v44, %v1557_v51  ;;  %v1095_v62 = vmul.f32 %v1081_v57, %v1081_v57 }
 0x4aa   :  { %v1096_v0 = vmul.f32 %v1082_v58, %v1082_v58  ;;  %v1087_v15 = vadd.f32 %v1082_v58, %v1081_v57 }
 0x4ac   :  { %v1101_v18 = vadd.f32 %v1096_v0, %v1095_v62 }
 0x4c6   :  { %v1005_v61 = vpop.f32.mrf.mxu0 }
 0x4c7   :  { %v1083_v12 = vmul.f32 %v1005_v61, %v1562_v56 }
 0x4c8   :  { %v1007_v14 = vpop.f32.mrf.mxu0 }
 0x4c9   :  { %v1097_v8 = vmul.f32 %v1083_v12, %v1083_v12  ;;  %v1084_v63 = vmul.f32 %v1007_v14, %v1564_v60  ;;  %v1088_v19 = vadd.f32 %v1087_v15, %v1083_v12 }
 0x4cb   :  { %v1102_v16 = vadd.f32 %v1101_v18, %v1097_v8  ;;  %v1098_v1 = vmul.f32 %v1084_v63, %v1084_v63  ;;  %v1089_v20 = vadd.f32 %v1088_v19, %v1084_v63 }
 0x4cd   :  { %v1103_v22 = vadd.f32 %v1102_v16, %v1098_v1 }
 0x4ce   :  { %v1076_v10 = vpop.f32.mrf.mxu1 }
 0x4cf   :  { %v1085_v21 = vmul.f32 %v1076_v10, %v1569_v9 }
 0x4d0   :  { %v1078_v23 = vpop.f32.mrf.mxu1 }
 0x4d1   :  { %v1090_v6 = vadd.f32 %v1089_v20, %v1085_v21  ;;  %v1099_v27 = vmul.f32 %v1085_v21, %v1085_v21  ;;  %v1086_v24 = vmul.f32 %v1078_v23, %v1573_v17 }
 0x4d3   :  { %v1104_v26 = vadd.f32 %v1103_v22, %v1099_v27  ;;  %v1091_v25 = vadd.f32 %v1090_v6, %v1086_v24  ;;  %v1100_v28 = vmul.f32 %v1086_v24, %v1086_v24 }
 0x4d5   :  { %1092 = vadd.xlane.f32.xlu0 %v1091_v25  ;;  %v1105_v11 = vadd.f32 %v1104_v26, %v1100_v28 }
 0x4d7   :  { %1106 = vadd.xlane.f32.xlu1 %v1105_v11 }
 0x55e   :  { %v1093_v49 = vpop.xlane.xlu0 %1092 }
 0x55f   :  { %v1094_v4 = vmul.f32 0.001953125, %v1093_v49 }
 0x560   :  { %v1107_v3 = vpop.xlane.xlu1 %1106 }
 0x561   :  { %v1109_v33 = vmul.f32 %v1094_v4, %v1094_v4  ;;  %v1108_v2 = vmul.f32 0.001953125, %v1107_v3 }
 0x563   :  { %v1110_v37 = vsub.f32 %v1108_v2, %v1109_v33 }
 0x565   :  { %v1111_v38 = vadd.f32 1e-05, %v1110_v37 }
 0x567   :  { %1189 = vrsqrt.f32 %v1111_v38 }
 0x574   :  { %v1190_v39 = vpop.eup %1189 }
 0x575   :  { %v1113_v32 = vmul.f32 %v1190_v39, %v1583_v35 }
 0x577   :  { %1122 = vperm.xlu1 %1185, %v1113_v32   ;;  %v1114_v40 = vmul.f32 %v1113_v32, %v1094_v4 }
 0x579   :  { %1116 = vrot.lane.b32.xlu0 %v1114_v40, %s1195_s28 }
 0x5eb   :  { %v1117_v30 = vpop.permute.xlu0 %1116 }
 0x5ec   :  { %v1119_v59 = vsub.f32 %v1583_v35, %v1117_v30 }
 0x5ee   :  { %1133 = vperm.xlu0 %1186, %v1119_v59  }
 0x5f2   :  { %v1123_v42 = vpop.permute.xlu1 %1122 }
 0x5f3   :  { %v1125_v13 = vmul.f32 %v1123_v42, %v934_v41  ;;  %v1126_v36 = vmul.f32 %v1123_v42, %v936_v44  ;;  %v1127_v31 = vmul.f32 %v1123_v42, %v1005_v61  ;;  %v1128_v34 = vmul.f32 %v1123_v42, %v1007_v14 }
 0x5f4   :  { %v1129_v45 = vmul.f32 %v1123_v42, %v1076_v10  ;;  %v1130_v46 = vmul.f32 %v1123_v42, %v1078_v23 }
 0x669   :  { %v1134_v47 = vpop.permute.xlu0 %1133 }
 0x66a   :  { %v1136_v43 = vadd.f32 %v1134_v47, %v1125_v13  ;;  %v1137_v53 = vadd.f32 %v1134_v47, %v1126_v36  ;;  %v1138_v48 = vadd.f32 %v1134_v47, %v1127_v31  ;;  %v1139_v54 = vadd.f32 %v1134_v47, %v1128_v34 }
 0x66b   :  { %v1140_v55 = vadd.f32 %v1134_v47, %v1129_v45  ;;  %v1141_v7 = vadd.f32 %v1134_v47, %v1130_v46 }
 0x66c   :  { %v1142_v52 = vmax.f32 %v1136_v43, 0.0  ;;  %v1143_v57 = vmax.f32 %v1137_v53, 0.0  ;;  %v1144_v58 = vmax.f32 %v1138_v48, 0.0  ;;  %v1145_v62 = vmax.f32 %v1139_v54, 0.0 }
 0x66d   :  { %v1146_v35 = vmax.f32 %v1140_v55, 0.0  ;;  %v1147_v0 = vmax.f32 %v1141_v7, 0.0 }
 0x66e   :  { %v1148_v41 = vmul.f32 %v1142_v52, %v1555_v50  ;;  %v1149_v44 = vmul.f32 %v1143_v57, %v1557_v51  ;;  %v1150_v61 = vmul.f32 %v1144_v58, %v1562_v56  ;;  %v1151_v12 = vmul.f32 %v1145_v62, %v1564_v60 }
 0x66f   :  { %v1152_v14 = vmul.f32 %v1146_v35, %v1569_v9  ;;  %v1153_v15 = vmul.f32 %v1147_v0, %v1573_v17 }
 0x670   :  { %1154 = vst [vmem:[%s1913_s5] sm:$0xff] %v1148_v41  ;;  %1155 = vst [vmem:[%s1913_s5 + $0x8] sm:$0xff] %v1149_v44 }
 0x671   :  { %1156 = vst [vmem:[%s1913_s5 + $0x10] sm:$0xff] %v1150_v61  ;;  %1157 = vst [vmem:[%s1913_s5 + $0x18] sm:$0xff] %v1151_v12 }
 0x672   :  { %1158 = vst [vmem:[%s1913_s5 + $0x20] sm:$0xff] %v1152_v14  ;;  %1159 = vst [vmem:[%s1913_s5 + $0x28] sm:$0xff] %v1153_v15 }

</bundles_post_ra>
